<compile_context>
chip_gen: v6e
topology: v6e:2x2x1
jax: 0.10.0
libtpu: 0.0.40
codegen_flags: <defaults>
</compile_context>

<pallas_src>
import functools

import jax
import jax.numpy as jnp
from jax import lax
from jax.experimental import pallas as pl
from jax.experimental.pallas import tpu as pltpu

LANE = 128
SUBLANE = 8


def _cdiv(a, b):
    return -(-a // b)


def _round_up(x, m):
    return _cdiv(x, m) * m


def _vmem_budget():
    """Generation-aware VMEM sizing.

    Returns (tile_budget_bytes, scoped_vmem_limit_bytes). v5e/v6e have
    128 MiB physical VMEM, v7x only 64 MiB per TensorCore; fall back to the
    conservative 64 MiB figure if the query is unavailable.
    """
    cap = 64 * 1024 * 1024
    try:
        info = pltpu.get_tpu_info()
        cap = int(getattr(info, "vmem_capacity_bytes", cap)) or cap
    except Exception:
        pass
    budget = min(24 * 1024 * 1024, cap // 3)           # resident working set
    limit = min(cap * 3 // 4, max(2 * budget, 32 * 1024 * 1024))
    return int(budget), int(limit)


def _choose_rows(n_rows, in_itemsize, out_itemsize, budget_bytes, reduce_path):
    """Rows-per-tile from a path-specific VMEM budget (no row padding).

    If everything fits in one tile we use the full row extent (block == array
    dim, always legal); otherwise rows is a multiple of 8 and the last tile is
    a partial boundary block handled in-kernel.
    """
    if reduce_path:
        # x & t double-buffered + one f32 accumulator tile; output is tiny.
        per_row_bytes = LANE * (2 * 2 * in_itemsize + 4)
    else:
        # x, t and out tiles, all double-buffered; no accumulator.
        per_row_bytes = LANE * (2 * 2 * in_itemsize + 2 * out_itemsize)
    max_rows = max(SUBLANE, (budget_bytes // per_row_bytes) // SUBLANE * SUBLANE)
    if n_rows <= max_rows:
        return n_rows, 1
    rows = max_rows
    return rows, _cdiv(n_rows, rows)


# ---------------------------------------------------------------------------
# Kernels
# ---------------------------------------------------------------------------
def _weighted_sq_none_kernel(w_ref, x_ref, t_ref, o_ref):
    # reduction='none': per-element weighted squared error for this tile.
    # w_ref is the full (B,) weight vector in SMEM (scalar prefetch).
    # Boundary row-tiles need no masking: out-of-range stores are dropped.
    b = pl.program_id(0)
    d = x_ref[...].astype(jnp.float32) - t_ref[...].astype(jnp.float32)
    o_ref[...] = (w_ref[b] * d * d).astype(o_ref.dtype)


def _sq_partial_sum_kernel(w_ref, x_ref, t_ref, o_ref, acc_ref, *,
                           rows, tiles_per_chunk, total_rows, needs_mask):
    # reduction='sum'/'mean': accumulate sum-of-squares per (batch, chunk)
    # into a tile-shaped f32 scratch (pure VPU adds); the cross-lane work and
    # the per-batch weight are applied once at the last step of each chunk.
    b = pl.program_id(0)
    c = pl.program_id(1)
    r = pl.program_id(2)

    @pl.when(r == 0)
    def _():
        acc_ref[...] = jnp.zeros_like(acc_ref)

    d = x_ref[...].astype(jnp.float32) - t_ref[...].astype(jnp.float32)
    contrib = d * d
    if needs_mask:  # static: emitted only when the row tiling is inexact
        row0 = (c * tiles_per_chunk + r) * rows
        local = lax.broadcasted_iota(jnp.int32, contrib.shape, 1)
        contrib = jnp.where(row0 + local < total_rows, contrib, 0.0)
    acc_ref[...] = acc_ref[...] + contrib

    @pl.when(r == tiles_per_chunk - 1)
    def _():
        # (1, rows, 128) -> (1, 1, 128); already weighted (and /N for 'mean').
        partial = w_ref[b] * jnp.sum(acc_ref[...], axis=1, keepdims=True)
        o_ref[...] = partial.reshape(o_ref.shape)


# ---------------------------------------------------------------------------
# Wrapper (the "BaseLoss" module)
# ---------------------------------------------------------------------------
class BaseLossPallas:
    """Weighted elementwise loss with 'none' | 'mean' | 'sum' reduction."""

    def __init__(self, weight=None, reduction="mean"):
        assert reduction in ("none", "mean", "sum")
        self.weight = weight
        self.reduction = reduction

    def __call__(self, inputs, targets):
        assert inputs.shape == targets.shape
        orig_shape = inputs.shape
        B = orig_shape[0]
        n_elems = 1
        for s in orig_shape:
            n_elems *= int(s)

        # Flatten NCHW -> (B, F)
        x = inputs.reshape(B, -1)
        t = targets.reshape(B, -1)
        F = x.shape[1]

        # Per-batch rescaling weight as a flat (B,) f32 vector (SMEM scalars).
        if self.weight is None:
            w = jnp.ones((B,), dtype=jnp.float32)
        else:
            w = jnp.asarray(self.weight, dtype=jnp.float32).reshape(B)

        # Lane-dense view: each batch element becomes (R, 128). Only the lane
        # remainder (< 128 elems per batch) is zero padded, and only when
        # needed; the row axis is never padded.
        R = _cdiv(F, LANE)
        F_pad = R * LANE
        if F_pad != F:
            pad = ((0, 0), (0, F_pad - F))
            x = jnp.pad(x, pad)
            t = jnp.pad(t, pad)
        x3 = x.reshape(B, R, LANE)
        t3 = t.reshape(B, R, LANE)

        in_item = max(jnp.dtype(inputs.dtype).itemsize,
                      jnp.dtype(targets.dtype).itemsize)
        budget, vmem_limit = _vmem_budget()

        if self.reduction == "none":
            # Output in the input dtype (halves bf16 writeback); deviates from
            # an all-f32 reference by design.
            out_dtype = inputs.dtype
            rows, n_tiles = _choose_rows(R, in_item,
                                         jnp.dtype(out_dtype).itemsize,
                                         budget, reduce_path=False)
            out = pl.pallas_call(
                _weighted_sq_none_kernel,
                out_shape=jax.ShapeDtypeStruct((B, R, LANE), out_dtype),
                grid_spec=pltpu.PrefetchScalarGridSpec(
                    num_scalar_prefetch=1,
                    grid=(B, n_tiles),
                    in_specs=[
                        pl.BlockSpec((1, rows, LANE), lambda b, r, *_: (b, r, 0)),
                        pl.BlockSpec((1, rows, LANE), lambda b, r, *_: (b, r, 0)),
                    ],
                    out_specs=pl.BlockSpec((1, rows, LANE),
                                           lambda b, r, *_: (b, r, 0)),
                ),
                compiler_params=pltpu.CompilerParams(
                    dimension_semantics=("parallel", "parallel"),
                    vmem_limit_bytes=vmem_limit,
                ),
            )(w, x3, t3)
            return out.reshape(B, F_pad)[:, :F].reshape(orig_shape)

        # ---- sum / mean -----------------------------------------------------
        rows, n_tiles = _choose_rows(R, in_item, 4, budget, reduce_path=True)
        # With a single batch element and a single tile, force a row split so
        # the parallel chunk axis below can occupy both v7x TensorCores.
        if B == 1 and n_tiles == 1 and R >= 2 * SUBLANE:
            rows = _round_up(_cdiv(R, 2), SUBLANE)
            n_tiles = _cdiv(R, rows)

        # Parallel row-chunk axis (harmless serial loop on single-TC chips).
        n_chunks = 2 if n_tiles >= 2 else 1
        tpc = _cdiv(n_tiles, n_chunks)
        needs_mask = (n_chunks * tpc * rows) != R
        clamp = (n_chunks * tpc) > n_tiles
        last_tile = n_tiles - 1

        if clamp:
            def in_map(b, c, r, *_):
                return (b, jnp.minimum(c * tpc + r, last_tile), 0)
        else:
            def in_map(b, c, r, *_):
                return (b, c * tpc + r, 0)

        # Fold the 1/N of 'mean' into the prefetched per-batch weight so the
        # kernel emits fully scaled partials and the wrapper tail is one sum.
        w_scaled = w / float(n_elems) if self.reduction == "mean" else w

        kernel = functools.partial(
            _sq_partial_sum_kernel,
            rows=rows, tiles_per_chunk=tpc, total_rows=R, needs_mask=needs_mask)

        partials = pl.pallas_call(
            kernel,
            out_shape=jax.ShapeDtypeStruct((B, n_chunks, 1, LANE), jnp.float32),
            grid_spec=pltpu.PrefetchScalarGridSpec(
                num_scalar_prefetch=1,
                grid=(B, n_chunks, tpc),
                in_specs=[
                    pl.BlockSpec((1, rows, LANE), in_map),
                    pl.BlockSpec((1, rows, LANE), in_map),
                ],
                out_specs=pl.BlockSpec((1, 1, 1, LANE),
                                       lambda b, c, r, *_: (b, c, 0, 0)),
                scratch_shapes=[pltpu.VMEM((1, rows, LANE), jnp.float32)],
            ),
            compiler_params=pltpu.CompilerParams(
                dimension_semantics=("parallel", "parallel", "arbitrary"),
                vmem_limit_bytes=vmem_limit,
            ),
        )(w_scaled, x3, t3)

        return jnp.sum(partials)


# ---------------------------------------------------------------------------
# Demo / self-check
# ---------------------------------------------------------------------------
if __name__ == "__main__":
    key = jax.random.PRNGKey(0)
    ok = True

    # Second shape is deliberately unaligned (F = 315) to exercise lane
    # padding + in-kernel boundary handling.
    for shape in ((2, 4, 16, 16), (3, 5, 7, 9)):
        k1, k2, key = jax.random.split(key, 3)
        inputs = jax.random.normal(k1, shape, dtype=jnp.float32)
        targets = jax.random.normal(k2, shape, dtype=jnp.float32)
        B = shape[0]
        weight = 0.5 + 0.25 * jnp.arange(B, dtype=jnp.float32)

        d = inputs - targets
        wexp = weight.reshape((B,) + (1,) * (len(shape) - 1))
        ref_none = wexp * d * d
        ref_sum = jnp.sum(ref_none)
        ref_mean = ref_sum / ref_none.size

        for reduction, ref in (("none", ref_none),
                               ("sum", ref_sum),
                               ("mean", ref_mean)):
            out = BaseLossPallas(weight=weight, reduction=reduction)(inputs, targets)
            out = jax.block_until_ready(out)
            if not jnp.allclose(out, ref, rtol=1e-5, atol=1e-5):
                ok = False
                print(f"MISMATCH shape={shape} reduction={reduction}")

        # Default (weight=None, reduction='mean') path.
        out_default = jax.block_until_ready(BaseLossPallas()(inputs, targets))
        if not jnp.allclose(out_default, jnp.mean(d * d), rtol=1e-5, atol=1e-5):
            ok = False
            print(f"MISMATCH shape={shape} default weight=None / mean")

    # TODO(synk): BaseLoss.forward is abstract in PyTorch; the per-element loss
    # here (squared error) is a concrete stand-in exercising weight+reduction.
    if ok:
        print("KERNEL_OK")
</pallas_src>

<mosaic_0001>
module attributes {stable_mosaic.version = 11 : i64} {
  func.func @_weighted_sq_none_kernel(%arg0: i32, %arg1: i32, %arg2: memref<2xf32, #tpu.memory_space<smem>>, %arg3: memref<1x8x128xf32, #tpu.memory_space<vmem>>, %arg4: memref<1x8x128xf32, #tpu.memory_space<vmem>>, %arg5: memref<1x8x128xf32, #tpu.memory_space<vmem>>) attributes {dimension_semantics = [#tpu.dimension_semantics<parallel>, #tpu.dimension_semantics<parallel>], iteration_bounds = array<i64: 2, 1>, scalar_prefetch = 1 : i64, scratch_operands = 0 : i64, tpu.core_type = #tpu.core_type<tc>, window_params = [{transform_indices = @transform_0, window_bounds = array<i64: 1, 8, 128>}, {transform_indices = @transform_1, window_bounds = array<i64: 1, 8, 128>}, {transform_indices = @transform_2, window_bounds = array<i64: 1, 8, 128>}]} {
    %c0 = arith.constant 0 : index
    %c0_0 = arith.constant 0 : index
    %c0_1 = arith.constant 0 : index
    %0 = vector.load %arg3[%c0, %c0_0, %c0_1] : memref<1x8x128xf32, #tpu.memory_space<vmem>>, vector<1x8x128xf32>
    %c0_2 = arith.constant 0 : index
    %c0_3 = arith.constant 0 : index
    %c0_4 = arith.constant 0 : index
    %1 = vector.load %arg4[%c0_2, %c0_3, %c0_4] : memref<1x8x128xf32, #tpu.memory_space<vmem>>, vector<1x8x128xf32>
    %2 = arith.subf %0, %1 : vector<1x8x128xf32>
    %3 = arith.index_cast %arg0 : i32 to index
    %4 = memref.load %arg2[%3] : memref<2xf32, #tpu.memory_space<smem>>
    %5 = vector.broadcast %4 : f32 to vector<1x8x128xf32>
    %6 = arith.mulf %5, %2 : vector<1x8x128xf32>
    %7 = arith.mulf %6, %2 : vector<1x8x128xf32>
    %c0_5 = arith.constant 0 : index
    %c0_6 = arith.constant 0 : index
    %c0_7 = arith.constant 0 : index
    %8 = vector.load %arg5[%c0_5, %c0_6, %c0_7] : memref<1x8x128xf32, #tpu.memory_space<vmem>>, vector<1x8x128xf32>
    tpu.vector_store %arg5[%c0_5, %c0_6, %c0_7], %7 {strides = array<i32>} : memref<1x8x128xf32, #tpu.memory_space<vmem>>, vector<1x8x128xf32>,
    return
  }
  func.func @transform_0(%arg0: i32, %arg1: i32, %arg2: memref<2xf32, #tpu.memory_space<smem>>) -> (i32, i32, i32) {
    %c0_i32 = arith.constant 0 : i32
    %c0_i32_0 = arith.constant 0 : i32
    return %arg0, %arg1, %c0_i32 : i32, i32, i32
  }
  func.func @transform_1(%arg0: i32, %arg1: i32, %arg2: memref<2xf32, #tpu.memory_space<smem>>) -> (i32, i32, i32) {
    %c0_i32 = arith.constant 0 : i32
    %c0_i32_0 = arith.constant 0 : i32
    return %arg0, %arg1, %c0_i32 : i32, i32, i32
  }
  func.func @transform_2(%arg0: i32, %arg1: i32, %arg2: memref<2xf32, #tpu.memory_space<smem>>) -> (i32, i32, i32) {
    %c0_i32 = arith.constant 0 : i32
    %c0_i32_0 = arith.constant 0 : i32
    return %arg0, %arg1, %c0_i32 : i32, i32, i32
  }
}

</mosaic_0001>

<bundles_post_ra>
// kernel: tpu_custom_call.1
= control target key start
LH: loop header
LB: loop body
LE: loop exit
PB: predicated region body
PF: predicated region fallthrough
CT: control target
= control target key end

     0   :  { %s584_s12 = smov [#allocation3]   ;;  %s773_s0 = inlined_call_operand.hbm [shape: f32[2], index: 0, kind: input, shape index: {}]   ;;  %s774_s1 = inlined_call_operand.hbm [shape: f32[2,8,128], index: 1, kind: input, shape index: {}]   ;;  %s775_s2 = inlined_call_operand.hbm [shape: f32[2,8,128], index: 2, kind: input, shape index: {}]   ;;  %s776_s3 = inlined_call_operand.hbm [shape: f32[2,8,128], index: 3, kind: output, shape index: {}]  }
   0x1   :  { %9 = dma.hbm_to_smem %s773_s0, 16, %s584_s12, [#allocation2] }
   0x2   :  { %546 = dma.done.wait [#allocation2], 16 }
   0x3   :  { %547 = vsyncadd [#allocation2], 4294967280 }
   0x4   :  { %11 = sfence }
   0x5   :  { %12 = vsyncpa [#allocation5], 0 }
   0x6   :  { %14 = vsyncpa [#allocation5 + $0x1], 0 }
   0x7   :  { %15 = vsyncpa [#allocation8], 0 }
   0x8   :  { %17 = vsyncpa [#allocation8 + $0x1], 0 }
   0x9   :  { %18 = vsyncpa [#allocation6], 0 }
   0xa   :  { %20 = vsyncpa [#allocation6 + $0x1], 0  ;;  %s611_s15 = smov 0   ;;  %s613_s16 = smov 0  }
   0xb   :  { %s615_s17 = smov 0   ;;  %s617_s18 = smov 0  }
   0xc   :  { %s619_s19 = smov 0   ;;  %s621_s0 = smov 0  }
   0xd LB: > { %s348_s20 = sadd.s32 4294967295, %s582_s0   ;;  %s349_s21 = sadd.s32 4294967294, %s582_s0   ;;  %s582_s0 = sphi %s621_s0, %s26_s0   ;;  %s578_s19 = sphi %s619_s19, %s788_s19   ;;  %s574_s18 = sphi %s617_s18, %s787_s18   ;;  %s570_s17 = sphi %s615_s17, %s786_s17   ;;  %s566_s16 = sphi %s613_s16, %s785_s16   ;;  %s562_s15 = sphi %s611_s15, %s784_s15  }
   0xe   : > { %s38_s22 = sadd.s32 1, %s578_s19  ;;  %s47_s23 = sadd.s32 1, %s570_s17 }
   0xf   : > { %p40_p0 = scmp.ge.s32.totalorder %s38_s22, 2  ;;  %p54_p1 = scmp.ne.s32.totalorder %s570_s17, %s566_s16 }
  0x10   : > { %p55_p2 = scmp.eq.s32.totalorder %s582_s0, 0  ;;  %p60_p3 = scmp.ne.s32.totalorder %s566_s16, %s562_s15 }
  0x11   : > { %s790_s22 = smov (%p40_p0, %s38_s22), 0  ;;  %p61_p5 = scmp.eq.s32.totalorder %s348_s20, 0 }
  0x12   : > { %p652_p4 = por %p55_p2, %p54_p1  ;;  %s42_s25 = ssub.s32 %s578_s19, %s790_s22 }
  0x13   : > { %p114_p6 = scmp.eq.s32.totalorder %s348_s20, 1  ;;  %p45_p7 = scmp.eq.s32.totalorder %s42_s25, 0 }
  0x14   : > { %p658_p8 = por %p61_p5, %p60_p3  ;;  %p120_p10 = scmp.eq.s32.totalorder %s349_s21, 1 }
  0x15   : > { %p662_p9 = por %p114_p6, %p54_p1  ;;  %p381_p13 = scmp.lt.s32.totalorder %s582_s0, 2 }
  0x16   : > { %s667_s28 = scalar_select %p45_p7, %s570_s17, %s47_s23  }
  0x17   : > { %p669_p11 = por %p120_p10, %p60_p3  ;;  %s676_s30 = sand.u32 1, %s570_s17  }
  0x18   : > { %s352_s4 = sshll.u32 %s676_s30, 3  ;;  %s353_s5 = sshll.u32 %s578_s19, 7 }
  0x19   : > { %s150_s8 = scalar_lea.hbm %s774_s1, %s353_s5  ;;  %s144_s9 = scalar_lea.vmem [#allocation4], %s352_s4 }
  0x1a   : > { %s152_s10 = sshll.u32 %s144_s9, 4  ;;  %p685_p0 = pnand %p381_p13, %p652_p4  ;;  %s153_s10 = int_to_ptr.vmem [resolvable:$true] %s152_s10 }
  0x1b   : > { %p356_p1 = scmp.ge.s32.totalorder %s582_s0, 1  ;;  %p176_p2 = scmp.lt.s32.totalorder %s582_s0, 3 }
  0x1c   : > { %s141_s12 = scalar_lea.sflag [#allocation5], %s676_s30  ;;  %p442_p3 = pneg %p685_p0 }
  0x1d   : > { %s453_s13 = scalar_lea.vmem %s153_s10, 128  ;;  %s585_s14 = smov [#allocation4]  }
  0x1e   : > { %p454_p5 = scmp.ne.s32.totalorder %s153_s10, %s453_s13  ;;  %s458_s20 = sshll.u32 %s585_s14, 4  ;;  %s459_s20 = int_to_ptr.vmem [resolvable:$false] %s458_s20 }
  0x1f   : > { %s460_s21 = scalar_lea.vmem %s459_s20, 256  ;;  %p461_p4 = scmp.lt.s32.totalorder %s153_s10, %s459_s20 }
  0x20   : > { %p456_p6 = pnand %p454_p5, %p442_p3  ;;  %p462_p10 = scmp.lt.s32.totalorder %s460_s21, %s453_s13 }
  0x22   : > { %p457_p7 = pneg %p456_p6  ;;  %p463_p13 = por %p462_p10, %p461_p4 }
  0x24   : > { %p464_p12 = pnand %p463_p13, %p457_p7 }
  0x26   : > { %467 = shalt.err (!%p464_p12)
}
  0x27   : > { %373 = dma.hbm_to_vmem [thread:$0]  (!%p685_p0), %s150_s8, 128, %s153_s10, %s141_s12  }
  0x28   : > { %p703_p5 = pnand %p356_p1, %p176_p2  ;;  %s169_s6 = scalar_lea.hbm %s775_s2, %s353_s5 }
  0x29   : > { %s163_s7 = scalar_lea.vmem [#allocation7], %s352_s4  ;;  %s160_s13 = scalar_lea.sflag [#allocation8], %s676_s30 }
  0x2a   : > { %s171_s9 = sshll.u32 %s163_s7, 4  ;;  %s586_s8 = smov [#allocation7]   ;;  %s172_s9 = int_to_ptr.vmem [resolvable:$true] %s171_s9 }
  0x2b   : > { %s481_s14 = scalar_lea.vmem %s172_s9, 128  ;;  %s486_s10 = sshll.u32 %s586_s8, 4  ;;  %s487_s10 = int_to_ptr.vmem [resolvable:$false] %s486_s10 }
  0x2c   : > { %p482_p12 = scmp.ne.s32.totalorder %s172_s9, %s481_s14  ;;  %s488_s12 = scalar_lea.vmem %s487_s10, 256 }
  0x2d   : > { %p489_p1 = scmp.lt.s32.totalorder %s172_s9, %s487_s10  ;;  %p490_p2 = scmp.lt.s32.totalorder %s488_s12, %s481_s14 }
  0x2e   : > { %p484_p6 = pnand %p482_p12, %p442_p3 }
  0x2f   : > { %p491_p4 = por %p490_p2, %p489_p1 }
  0x30   : > { %p485_p7 = pneg %p484_p6 }
  0x32   : > { %p492_p10 = pnand %p491_p4, %p485_p7 }
  0x34   : > { %495 = shalt.err (!%p492_p10)
}
  0x35   : > { %376 = dma.hbm_to_vmem [thread:$0]  (!%p685_p0), %s169_s6, 128, %s172_s9, %s160_s13  }
  0x36   : > { %180 = sbr.rel (%p703_p5) target bundleno = 86 (0x56), region = 28  ;;  %s719_s30 = sand.u32 (!%p703_p5), 1, %s566_s16  }
  0x37   : > { %s357_s4 = sshll.u32 (!%p703_p5), %s719_s30, 3  ;;  %s183_s5 = scalar_lea.sflag (!%p703_p5), [#allocation5], %s719_s30 }
  0x38   : > { %s186_s20 = scalar_lea.vmem (!%p703_p5), [#allocation4], %s357_s4 }
  0x3b   : > { %549 = dma.done.wait (%p658_p8), %s183_s5, 128  }
  0x3c   : > { %551 = vsyncadd (%p658_p8), %s183_s5, 4294967168  ;;  %s192_s11 = scalar_lea.sflag [#allocation8], %s719_s30  ;;  %s195_s21 = scalar_lea.vmem [#allocation7], %s357_s4 }
  0x3d   : > { %553 = dma.done.wait (%p658_p8), %s192_s11, 128  }
  0x3e   : > { %555 = vsyncadd (%p658_p8), %s192_s11, 4294967168  ;;  %s224_s23 = sld [smem:[#allocation3 + %s574_s18]]  ;;  %v221_v0 = vld [vmem:[%s186_s20] sm:$0xff]  ;;  %v222_v1 = vld [vmem:[%s195_s21] sm:$0xff]  ;;  %s220_s24 = scalar_lea.vmem [#allocation9], %s357_s4 }
  0x3f   : > { %v223_v3 = vsub.f32 %v221_v0, %v222_v1  ;;  %s244_s25 = sshll.u32 %s220_s24, 4  ;;  %s361_s6 = sshll.u32 %s574_s18, 7  ;;  %s245_s25 = int_to_ptr.vmem [resolvable:$true] %s244_s25 }
  0x40   : > { %s242_s26 = scalar_lea.hbm %s776_s3, %s361_s6  ;;  %s230_s13 = scalar_lea.sflag [#allocation6], %s719_s30 }
  0x41   : > { %s496_s14 = scalar_lea.vmem %s245_s25, 128  ;;  %s587_s8 = smov [#allocation9]  }
  0x42   : > { %p497_p8 = scmp.ne.s32.totalorder %s245_s25, %s496_s14  ;;  %s500_s10 = sshll.u32 %s587_s8, 4  ;;  %s501_s10 = int_to_ptr.vmem [resolvable:$false] %s500_s10 }
  0x43   : > { %s502_s12 = scalar_lea.vmem %s501_s10, 256  ;;  %p503_p13 = scmp.lt.s32.totalorder %s245_s25, %s501_s10 }
  0x44   : > { %v225_v2 = vstv %s224_s23  ;;  %p498_p0 = pnand %p497_p8, %p662_p9  ;;  %p504_p5 = scmp.lt.s32.totalorder %s502_s12, %s496_s14 }
  0x45   : > { %v226_v4 = vmul.f32 %v225_v2, %v223_v3 }
  0x46   : > { %p499_p3 = pneg %p498_p0  ;;  %p505_p12 = por %p504_p5, %p503_p13 }
  0x47   : > { %v227_v5 = vmul.f32 %v226_v4, %v223_v3 }
  0x48   : > { %p506_p6 = pnand %p505_p12, %p499_p3 }
  0x49   : > { %228 = vst [vmem:[%s220_s24] sm:$0xff] %v227_v5 }
  0x4a   : > { %509 = shalt.err (!%p506_p6)
}
  0x4b   : > { %s510_s18 = scalar_lea.hbm %s242_s26, 128  ;;  %s514_s5 = scalar_lea.hbm %s776_s3, 256 }
  0x4c   : > { %p511_p7 = scmp.ne.s32.totalorder %s242_s26, %s510_s18  ;;  %p515_p4 = scmp.lt.s32.totalorder %s242_s26, %s776_s3 }
  0x4d   : > { %p516_p10 = scmp.lt.s32.totalorder %s514_s5, %s510_s18 }
  0x4e   : > { %p512_p1 = pnand %p511_p7, %p662_p9 }
  0x4f   : > { %p517_p8 = por %p516_p10, %p515_p4 }
  0x50   : > { %p513_p2 = pneg %p512_p1 }
  0x52   : > { %p518_p0 = pnand %p517_p8, %p513_p2 }
  0x54   : > { %521 = shalt.err (!%p518_p0)
}
  0x55   : > { %368 = dma.vmem_to_hbm [thread:$0]  (%p662_p9), %s245_s25, 128, %s242_s26, %s230_s13  }
  0x56 PF: > { %s256_s21 = sand.u32 1, %s562_s15   ;;  %p783_p3 = scmp.ge.s32.totalorder %s582_s0, 2 }
  0x57   : > { %s257_s23 = scalar_lea.sflag [#allocation6], %s256_s21 }
  0x58   : > { %p378_p13 = pnand %p783_p3, %p669_p11 }
  0x5a   : > { %p379_p5 = pneg %p378_p13 }
  0x5c   : > { %557 = dma.done.wait (%p379_p5), %s257_s23, 128  }
  0x5d   : > { %559 = vsyncadd (%p379_p5), %s257_s23, 4294967168  ;;  %s26_s0 = sadd.s32 1, %s582_s0   ;;  %s784_s15 = smov %s566_s16 }
  0x5e   : > { %p23_p12 = scmp.ge.s32.totalorder %s26_s0, 4   ;;  %s785_s16 = smov %s570_s17 }
  0x5f   : > { %s786_s17 = smov %s667_s28  ;;  %s787_s18 = smov %s578_s19 }
  0x60   : > { %s788_s19 = smov %s790_s22  ;;  %25 = sbr.rel (!%p23_p12) target bundleno = 13 (0xd), region = 86 }
  0x65   :  { %262 = vsyncpa [#allocation5], 1 }
  0x66   :  { %264 = vsyncpa [#allocation5 + $0x1], 1 }
  0x67   :  { %265 = vsyncpa [#allocation8], 1 }
  0x68   :  { %267 = vsyncpa [#allocation8 + $0x1], 1 }
  0x69   :  { %268 = vsyncpa [#allocation6], 1 }
  0x6a   :  { %270 = vsyncpa [#allocation6 + $0x1], 1 }

</bundles_post_ra>
